<compile_context>
chip_gen: v7x
topology: tpu7x:2x2x1
jax: 0.10.0
libtpu: 0.0.40
codegen_flags: <defaults>
</compile_context>

<pallas_src>
import math

import numpy as np
import jax
import jax.numpy as jnp
from jax.experimental import pallas as pl
from jax.experimental.pallas import tpu as pltpu


def _to_mel(hz):
    return 2595.0 * np.log10(1.0 + hz / 700.0)


def _to_hz(mel):
    return 700.0 * (10.0 ** (mel / 2595.0) - 1.0)


def _round_up(x, m):
    return ((x + m - 1) // m) * m


def _cdiv(a, b):
    return -(-a // b)


class SincConvFastPallas:
    def __init__(self, out_channels, kernel_size, sinc_type, sample_rate=16000,
                 in_channels=1, stride=1, padding=0, dilation=1,
                 min_low_hz=50, min_band_hz=50, compute_dtype=jnp.bfloat16):
        if in_channels != 1:
            raise ValueError("SincConv only supports one input channel")
        self.out_channels = out_channels
        self.kernel_size = kernel_size + 1 if kernel_size % 2 == 0 else kernel_size
        self.stride = stride
        self.padding = padding
        self.dilation = dilation
        self.sample_rate = float(sample_rate)
        self.min_low_hz = float(min_low_hz)
        self.min_band_hz = float(min_band_hz)
        self.compute_dtype = compute_dtype

        low_hz = 30.0
        high_hz = self.sample_rate / 2.0 - (self.min_low_hz + self.min_band_hz)
        if sinc_type == 's1':
            mel = np.linspace(_to_mel(low_hz), _to_mel(high_hz), self.out_channels + 1)
            hz = _to_hz(mel)
        elif sinc_type == 's3':
            hz = np.linspace(low_hz, high_hz, self.out_channels + 1)
        else:
            raise NotImplementedError(f'Sinc type {sinc_type} is not supported')

        # Learnable params (deterministic init, mirrors the torch module __init__).
        self.low_hz_ = jnp.asarray(hz[:-1].reshape(-1, 1), dtype=jnp.float32)       # (C, 1)
        self.band_hz_ = jnp.asarray(np.diff(hz).reshape(-1, 1), dtype=jnp.float32)  # (C, 1)

        K = self.kernel_size
        n_lin = np.linspace(0.0, K / 2.0 - 1.0, int(K / 2))
        window = 0.54 - 0.46 * np.cos(2.0 * math.pi * n_lin / K)                    # (half,)
        n = (K - 1) / 2.0
        n_ = 2.0 * math.pi * np.arange(-n, 0.0) / self.sample_rate                  # (half,)

        self.n_ = jnp.asarray(n_.reshape(1, -1), dtype=jnp.float32)
        self.window_ = jnp.asarray(window.reshape(1, -1), dtype=jnp.float32)

    # ---- filter construction, hoisted OUT of the kernel (mirrors torch) ----
    def _filters(self):
        low = self.min_low_hz + jnp.abs(self.low_hz_)                               # (C, 1)
        high = jnp.clip(low + self.min_band_hz + jnp.abs(self.band_hz_),
                        self.min_low_hz, self.sample_rate / 2.0)                    # (C, 1)
        band = (high - low)[:, 0]                                                   # (C,)
        f_low = low * self.n_            # == matmul(low, n_) since inner dim is 1
        f_high = high * self.n_
        bp_left = (jnp.sin(f_high) - jnp.sin(f_low)) / (self.n_ / 2.0) * self.window_
        bp_center = 2.0 * band[:, None]
        bp_right = jnp.flip(bp_left, axis=1)
        band_pass = jnp.concatenate([bp_left, bp_center, bp_right], axis=1)
        band_pass = band_pass / (2.0 * band[:, None])                               # (C, K)
        return band_pass.astype(jnp.float32)

    # ---- im2col of the (padded) waveform (used only by the pure-JAX reference)
    def _patches(self, waveforms, dtype=jnp.float32):
        B, Cin, N = waveforms.shape
        assert Cin == 1, "SincConv only supports one input channel"
        x = waveforms[:, 0, :].astype(dtype)
        if self.padding > 0:
            x = jnp.pad(x, ((0, 0), (self.padding, self.padding)))
        Np = x.shape[1]
        K = self.kernel_size
        t_out = (Np - self.dilation * (K - 1) - 1) // self.stride + 1
        idx = (jnp.arange(t_out)[:, None] * self.stride
               + jnp.arange(K)[None, :] * self.dilation)                            # (T_out, K)
        return x[:, idx], t_out                                                     # (B, T_out, K)

    def __call__(self, waveforms):
        C, K = self.out_channels, self.kernel_size
        st, d = self.stride, self.dilation
        in_dt = self.compute_dtype
        x_bytes = int(np.dtype(in_dt).itemsize)

        B, Cin, N = waveforms.shape
        assert Cin == 1, "SincConv only supports one input channel"
        x = waveforms[:, 0, :].astype(jnp.float32)                                  # (B, N)
        if self.padding > 0:
            x = jnp.pad(x, ((0, 0), (self.padding, self.padding)))
        Np = x.shape[1]
        t_out = (Np - d * (K - 1) - 1) // st + 1
        if t_out <= 0:
            raise ValueError("Input too short for this kernel/stride/dilation")

        hop = 128 * st                        # input samples consumed per 128 outputs
        S = 127 * st + (K - 1) * d + 1        # input span touched by one 128-output row
        Mq = _cdiv(S, hop)
        S_ext = Mq * hop                      # contraction length (multiple of 128)

        # --- Toeplitz band weights: Tw[s, c*128 + r] = w[c, (s - r*st)/d] ---
        band_pass = self._filters()                                                 # (C, K) f32
        s_idx = np.arange(S_ext, dtype=np.int64)[:, None]
        r_idx = np.arange(128, dtype=np.int64)[None, :]
        delta = s_idx - r_idx * st                                                  # (S_ext, 128)
        kk = delta // d
        valid = (delta >= 0) & (delta % d == 0) & (kk < K)
        kk_c = np.clip(kk, 0, K - 1).astype(np.int32)
        Tw = jnp.where(valid[None, :, :], band_pass[:, kk_c], 0.0)                  # (C, S_ext, 128)

        # --- channel lane-grouping so a weight slab stays comfortably in VMEM ---
        wt_budget = 8 * 2**20
        Cg = int(max(1, min(C, wt_budget // (S_ext * 128 * x_bytes))))
        C_pad = _round_up(C, Cg)
        n_c = C_pad // Cg
        CNt = Cg * 128
        if C_pad > C:
            Tw = jnp.pad(Tw, ((0, C_pad - C), (0, 0), (0, 0)))
        Tw = Tw.transpose(1, 0, 2).reshape(S_ext, C_pad * 128).astype(in_dt)        # (S_ext, C_pad*128)

        # --- output-time tiling: 128 outputs per row, A_tile rows per grid step ---
        A_total = _cdiv(t_out, 128)
        cap = _round_up(A_total, 8)
        A_tile = 8
        for cand in (128, 64, 32, 16, 8):
            if cand > cap:
                continue
            need = (2 * S_ext * CNt * x_bytes            # resident/double-buffered weights
                    + 2 * cand * CNt * 4                 # output double buffer (f32)
                    + 2 * (cand + Mq - 1) * hop * x_bytes
                    + cand * S_ext * x_bytes             # assembled Xrow tile
                    + (2 << 20))
            if need <= 24 * 2**20:
                A_tile = cand
                break
        A_pad = _round_up(A_total, A_tile)
        n_j = A_pad // A_tile
        Rpt = A_tile + Mq - 1                 # waveform rows per (overlapping) input slab

        # --- overlapping row-slabs of the raw waveform (overlap ~ (Mq-1)/A_tile) ---
        P = A_pad + Mq - 1
        total = hop * P
        if total >= Np:
            x_ext = jnp.pad(x, ((0, 0), (0, total - Np)))
        else:
            x_ext = x[:, :total]              # samples beyond this are never needed
        x_ext = x_ext.astype(in_dt)
        Zraw = x_ext.reshape(B, P, hop)                                              # Zraw[b,p,q]=x[b,hop*p+q]
        row_idx = (np.arange(n_j) * A_tile)[:, None] + np.arange(Rpt)[None, :]       # (n_j, Rpt)
        XT = Zraw[:, row_idx, :]                                                     # (B, n_j, Rpt, hop)

        a_tile, mq = A_tile, Mq

        def sinc_kernel(w_ref, x_ref, o_ref):
            # w_ref: (S_ext, CNt) bf16   -- Toeplitz weights, constant across inner axis
            # x_ref: (Rpt, hop)   bf16   -- overlapping waveform row-slab for this tile
            # o_ref: (A_tile, CNt) f32
            parts = [x_ref[pl.ds(m, a_tile), :] for m in range(mq)]   # Mq sublane-shifted views
            xmat = parts[0] if mq == 1 else jnp.concatenate(parts, axis=1)  # (A_tile, S_ext)
            o_ref[...] = jax.lax.dot_general(
                xmat, w_ref[...],
                dimension_numbers=(((1,), (0,)), ((), ())),
                preferred_element_type=jnp.float32,
            )

        vmem_need = (2 * S_ext * CNt * x_bytes + 2 * A_tile * CNt * 4
                     + 2 * Rpt * hop * x_bytes + A_tile * S_ext * x_bytes + (4 << 20))
        vmem_limit = int(min(max(int(vmem_need * 1.5), 32 * 2**20), 48 * 2**20))

        out_blocks = pl.pallas_call(
            sinc_kernel,
            out_shape=jax.ShapeDtypeStruct((B, A_pad, C_pad * 128), jnp.float32),
            grid=(B, n_c, n_j),
            in_specs=[
                pl.BlockSpec((S_ext, CNt), lambda b, c, j: (0, c)),            # Toeplitz weights
                pl.BlockSpec((None, None, Rpt, hop), lambda b, c, j: (b, j, 0, 0)),  # waveform slab
            ],
            out_specs=pl.BlockSpec((None, A_tile, CNt), lambda b, c, j: (b, j, c)),
            compiler_params=pltpu.CompilerParams(
                dimension_semantics=("parallel", "parallel", "parallel"),
                vmem_limit_bytes=vmem_limit),
        )(Tw, XT)

        # Layout plumbing back to (B, C, T): cheap XLA transpose on a small f32 slab.
        out = out_blocks.reshape(B, A_pad, C_pad, 128).transpose(0, 2, 1, 3)
        out = out.reshape(B, C_pad, A_pad * 128)
        return out[:, :C, :t_out]

    # ---- pure-JAX reference (mirrors the torch forward) ---------------------
    def reference(self, waveforms, cast_dtype=None):
        band_pass = self._filters()
        patches, _ = self._patches(waveforms, dtype=jnp.float32)
        if cast_dtype is not None:
            band_pass = band_pass.astype(cast_dtype)
            patches = patches.astype(cast_dtype)
        return jnp.einsum('ck,btk->bct', band_pass, patches,
                          preferred_element_type=jnp.float32,
                          precision=jax.lax.Precision.HIGHEST)


if __name__ == "__main__":
    key = jax.random.PRNGKey(0)
    B, N = 2, 64
    out_channels, kernel_size = 4, 16   # kernel_size bumps to 17 (odd), like the module

    conv = SincConvFastPallas(out_channels=out_channels, kernel_size=kernel_size,
                              sinc_type='s1', sample_rate=16000)
    waveforms = jax.random.normal(key, (B, 1, N), dtype=jnp.float32)

    out = jax.block_until_ready(conv(waveforms))
    assert out.shape == (B, out_channels, N - conv.kernel_size + 1), out.shape

    # 1) Matched-precision check: same bf16-rounded inputs, f32 accumulation.
    ref_matched = conv.reference(waveforms, cast_dtype=conv.compute_dtype)
    np.testing.assert_allclose(np.asarray(out), np.asarray(ref_matched),
                               rtol=2e-3, atol=2e-3)

    # 2) Semantics check vs the full-f32 torch-equivalent forward
    #    (tolerance accounts for bf16 streaming of the filter/waveform).
    ref_f32 = conv.reference(waveforms)
    np.testing.assert_allclose(np.asarray(out), np.asarray(ref_f32),
                               rtol=5e-2, atol=5e-2)

    print("KERNEL_OK")
</pallas_src>

<mosaic_0001>
module attributes {stable_mosaic.version = 11 : i64} {
  func.func @sinc_kernel(%arg0: i32, %arg1: i32, %arg2: i32, %arg3: memref<256x512xbf16, #tpu.memory_space<vmem>>, %arg4: memref<1x1x9x128xbf16, #tpu.memory_space<vmem>>, %arg5: memref<1x8x512xf32, #tpu.memory_space<vmem>>) attributes {dimension_semantics = [#tpu.dimension_semantics<parallel>, #tpu.dimension_semantics<parallel>, #tpu.dimension_semantics<parallel>], iteration_bounds = array<i64: 2, 1, 1>, scalar_prefetch = 0 : i64, scratch_operands = 0 : i64, tpu.core_type = #tpu.core_type<tc>, window_params = [{transform_indices = @transform_0, window_bounds = array<i64: 256, 512>}, {transform_indices = @transform_1, window_bounds = array<i64: 1, 1, 9, 128>}, {transform_indices = @transform_2, window_bounds = array<i64: 1, 8, 512>}]} {
    %c0 = arith.constant 0 : index
    %c0_0 = arith.constant 0 : index
    %c0_1 = arith.constant 0 : index
    %c0_2 = arith.constant 0 : index
    %0 = vector.load %arg4[%c0, %c0_0, %c0_1, %c0_2] : memref<1x1x9x128xbf16, #tpu.memory_space<vmem>>, vector<1x1x8x128xbf16>
    %1 = vector.shape_cast %0 : vector<1x1x8x128xbf16> to vector<8x128xbf16>
    %c0_3 = arith.constant 0 : index
    %c0_4 = arith.constant 0 : index
    %c1 = arith.constant 1 : index
    %c0_5 = arith.constant 0 : index
    %2 = vector.load %arg4[%c0_3, %c0_4, %c1, %c0_5] : memref<1x1x9x128xbf16, #tpu.memory_space<vmem>>, vector<1x1x8x128xbf16>
    %3 = vector.shape_cast %2 : vector<1x1x8x128xbf16> to vector<8x128xbf16>
    %4 = tpu.concatenate %1, %3 in 1 : vector<8x128xbf16>, vector<8x128xbf16> -> vector<8x256xbf16>
    %c0_6 = arith.constant 0 : index
    %c0_7 = arith.constant 0 : index
    %5 = vector.load %arg3[%c0_6, %c0_7] : memref<256x512xbf16, #tpu.memory_space<vmem>>, vector<256x512xbf16>
    %cst = arith.constant dense<0.000000e+00> : vector<8x512xf32>
    %6 = tpu.matmul %4, %5, %cst {dimension_numbers = #tpu.dot_dimension_numbers<[1], [0], [0], [1], [0, 0, 1, 1], [], []>} : vector<8x256xbf16>, vector<256x512xbf16>, vector<8x512xf32> -> vector<8x512xf32>
    %c0_8 = arith.constant 0 : index
    %c0_9 = arith.constant 0 : index
    %c0_10 = arith.constant 0 : index
    %7 = vector.load %arg5[%c0_8, %c0_9, %c0_10] : memref<1x8x512xf32, #tpu.memory_space<vmem>>, vector<1x8x512xf32>
    %8 = vector.shape_cast %7 : vector<1x8x512xf32> to vector<8x512xf32>
    %9 = vector.shape_cast %6 : vector<8x512xf32> to vector<1x8x512xf32>
    tpu.vector_store %arg5[%c0_8, %c0_9, %c0_10], %9 {strides = array<i32>} : memref<1x8x512xf32, #tpu.memory_space<vmem>>, vector<1x8x512xf32>,
    return
  }
  func.func @transform_0(%arg0: i32, %arg1: i32, %arg2: i32) -> (i32, i32) {
    %c0_i32 = arith.constant 0 : i32
    %c0_i32_0 = arith.constant 0 : i32
    return %c0_i32, %arg1 : i32, i32
  }
  func.func @transform_1(%arg0: i32, %arg1: i32, %arg2: i32) -> (i32, i32, i32, i32) {
    %c0_i32 = arith.constant 0 : i32
    %c0_i32_0 = arith.constant 0 : i32
    %c0_i32_1 = arith.constant 0 : i32
    return %arg0, %arg2, %c0_i32, %c0_i32_0 : i32, i32, i32, i32
  }
  func.func @transform_2(%arg0: i32, %arg1: i32, %arg2: i32) -> (i32, i32, i32) {
    %c0_i32 = arith.constant 0 : i32
    return %arg0, %arg2, %arg1 : i32, i32, i32
  }
}

</mosaic_0001>

<bundles_post_ra>
// kernel: tpu_custom_call.1
= control target key start
LH: loop header
LB: loop body
LE: loop exit
PB: predicated region body
PF: predicated region fallthrough
CT: control target
= control target key end

     0   :  { %7 = vsyncpa [#allocation3], 0  ;;  %s1334_s0 = inlined_call_operand.hbm [shape: bf16[256,512], index: 0, kind: input, shape index: {}]   ;;  %s1335_s1 = inlined_call_operand.vmem [shape: bf16[2,1,9,128], index: 1, kind: input, shape index: {}]   ;;  %s1336_s2 = inlined_call_operand.hbm [shape: f32[2,8,512], index: 2, kind: output, shape index: {}]  }
   0x1   :  { %8 = vsyncpa [#allocation4], 0 }
   0x2   :  { %10 = vsyncpa [#allocation4 + $0x1], 0  ;;  %s1184_s9 = smov 0   ;;  %s1186_s10 = smov 0  }
   0x3   :  { %s1188_s11 = smov 0   ;;  %s1190_s12 = smov 0  }
   0x4   :  { %s1192_s13 = smov 0   ;;  %s1194_s14 = smov 0  }
   0x5 LB: > { %s806_s15 = sadd.s32 4294967295, %s1163_s14   ;;  %s807_s16 = sadd.s32 4294967294, %s1163_s14   ;;  %s1163_s14 = sphi %s1194_s14, %s16_s14   ;;  %s1159_s13 = sphi %s1192_s13, %s1354_s13   ;;  %s1155_s12 = sphi %s1190_s12, %s1353_s12   ;;  %s1151_s11 = sphi %s1188_s11, %s1352_s11   ;;  %s1147_s10 = sphi %s1186_s10, %s1351_s10   ;;  %s1143_s9 = sphi %s1184_s9, %s1350_s9  }
   0x6   : > { %s35_s17 = sadd.s32 1, %s1159_s13  ;;  %s100_s18 = sadd.s32 1, %s1151_s11 }
   0x7   : > { %p37_p0 = scmp.ge.s32.totalorder %s35_s17, 2  ;;  %p110_p1 = scmp.ne.s32.totalorder %s1151_s11, %s1147_s10 }
   0x8   : > { %p111_p2 = scmp.eq.s32.totalorder %s806_s15, 1  ;;  %p116_p3 = scmp.ne.s32.totalorder %s1147_s10, %s1143_s9 }
   0x9   : > { %s1356_s17 = smov (%p37_p0, %s35_s17), 0  ;;  %p117_p5 = scmp.eq.s32.totalorder %s807_s16, 1 }
   0xa   : > { %p1224_p4 = por %p111_p2, %p110_p1  ;;  %s93_s20 = ssub.s32 %s1159_s13, %s1356_s17 }
   0xb   : > { %p808_p6 = scmp.ge.s32.totalorder %s1163_s14, 1  ;;  %p98_p7 = scmp.eq.s32.totalorder %s93_s20, 0 }
   0xc   : > { %s1341_s19 = scalar_select %p1224_p4, 1, 0 }
   0xd   : > { %p1231_p8 = por %p117_p5, %p116_p3  ;;  %p124_p9 = scmp.lt.s32.totalorder %s1163_s14, 3 }
   0xe   : > { %s1237_s22 = scalar_select %p98_p7, %s1151_s11, %s100_s18  }
   0xf   : > { %s1342_s21 = scalar_select %p1231_p8, 1, 0 }
  0x10   : > { %p1239_p10 = pnand %p808_p6, %p124_p9  ;;  %p1243_p11 = scmp.eq.s32.totalorder %s806_s15, 0 }
  0x11   : > { %s1165_s25 = smov [#allocation2]   ;;  %s1053_s30 = scalar_lea.hbm %s1334_s0, 8192 }
  0x12   : > { %s1343_s23 = scalar_select %p1239_p10, 1, 0 }
  0x13   : > { %s1344_s24 = scalar_select %p1243_p11, 1, 0 }
  0x14   : > { %p894_p12 = pneg %p1239_p10  ;;  %s139_s26 = sshll.u32 %s1165_s25, 4  ;;  %s140_s26 = int_to_ptr.vmem [resolvable:$true] %s139_s26 }
  0x15   : > { %p1054_p0 = scmp.ne.s32.totalorder %s1334_s0, %s1053_s30  ;;  %p1060_p5 = scmp.lt.u32.totalorder %s1053_s30, %s1334_s0 }
  0x16   : > { %p1251_p13 = pnand %p1243_p11, %p894_p12 }
  0x18   : > { %p1055_p1 = pneg %p1251_p13 }
  0x1a   : > { %p1056_p2 = pnand %p1055_p1, %p1054_p0 }
  0x1c   : > { %p1057_p3 = pneg %p1056_p2 }
  0x1e   : > { %p1062_p6 = pnand %p1060_p5, %p1057_p3 }
  0x20   : > { %1065 = shalt.err (!%p1062_p6)
}
  0x21   : > { %s1066_s7 = scalar_lea.vmem %s140_s26, 8192  ;;  %p1074_p8 = scmp.lt.s32.totalorder %s140_s26, %s140_s26 }
  0x22   : > { %p1067_p7 = scmp.ne.s32.totalorder %s140_s26, %s1066_s7  ;;  %p1075_p4 = scmp.lt.s32.totalorder %s1066_s7, %s1066_s7 }
  0x24   : > { %p1069_p9 = pnand %p1067_p7, %p1055_p1  ;;  %p1076_p11 = por %p1075_p4, %p1074_p8 }
  0x26   : > { %p1070_p12 = pneg %p1069_p9 }
  0x28   : > { %p1077_p10 = pnand %p1076_p11, %p1070_p12 }
  0x2a   : > { %1080 = shalt.err (!%p1077_p10)
}
  0x2b   : > { %s1166_s8 = smov 256   ;;  %s1167_s15 = smov 16  }
  0x2c   : > { %897 = dma.hbm_to_vmem [thread:$0]  (!%p1251_p13), %s1334_s0, 8192, %s140_s26, [#allocation3], %s1166_s8, %s1166_s8, %s1167_s15  }
  0x2d   : > { %p1346_p0 = scmp.ne.s32.totalorder %s1343_s23, 0 }
  0x2e   : > { %p1347_p2 = scmp.ne.s32.totalorder (!%p1346_p0), %s1344_s24, 0 }
  0x2f   : > { %167 = sbr.rel (%p1346_p0) target bundleno = 348 (0x15c), region = 28 }
  0x36   : > { %1134 = dma.done.wait (%p1347_p2), [#allocation3], 8192  }
  0x37   : > { %1136 = vsyncadd (%p1347_p2), [#allocation3], 4294959104  ;;  %v956_v0 = vld [vmem:[#allocation2 + $0x4] ss:$16 sps:$4 sm:$0xff]   ;;  %v958_v1 = vld [vmem:[#allocation2 + $0xc] ss:$16 sps:$4 sm:$0xff]  }
  0x38   : > { %603 = vmatprep.subr.bf16.mxu0 %v956_v0  ;;  %v960_v2 = vld [vmem:[#allocation2] ss:$16 sps:$4 sm:$0xff]   ;;  %v961_v3 = vld [vmem:[#allocation2 + $0x8] ss:$16 sps:$4 sm:$0xff]   ;;  %644 = vmatprep.subr.bf16.mxu1 %v958_v1  ;;  %v962_v4 = vld [vmem:[#allocation2 + $0x24] ss:$16 sps:$4 sm:$0xff]  }
  0x39   : > { %604 = vmatpush1.bf16.msra.mxu0 %v960_v2  ;;  %645 = vmatpush1.bf16.msra.mxu1 %v961_v3  ;;  %v964_v5 = vld [vmem:[#allocation2 + $0x2c] ss:$16 sps:$4 sm:$0xff]   ;;  %v966_v6 = vld [vmem:[#allocation2 + $0x20] ss:$16 sps:$4 sm:$0xff]   ;;  %v967_v7 = vld [vmem:[#allocation2 + $0x28] ss:$16 sps:$4 sm:$0xff]  }
  0x3a   : > { %605 = vmatprep.subr.bf16.mxu0 %v962_v4  ;;  %646 = vmatprep.subr.bf16.mxu1 %v964_v5  ;;  %v968_v8 = vld [vmem:[#allocation2 + $0x44] ss:$16 sps:$4 sm:$0xff]   ;;  %v970_v9 = vld [vmem:[#allocation2 + $0x4c] ss:$16 sps:$4 sm:$0xff]   ;;  %v972_v10 = vld [vmem:[#allocation2 + $0x40] ss:$16 sps:$4 sm:$0xff]  }
  0x3b   : > { %v973_v11 = vld [vmem:[#allocation2 + $0x48] ss:$16 sps:$4 sm:$0xff]   ;;  %v974_v12 = vld [vmem:[#allocation2 + $0x64] ss:$16 sps:$4 sm:$0xff]   ;;  %v976_v13 = vld [vmem:[#allocation2 + $0x6c] ss:$16 sps:$4 sm:$0xff]  }
  0x3c   : > { %v978_v14 = vld [vmem:[#allocation2 + $0x60] ss:$16 sps:$4 sm:$0xff]   ;;  %v979_v15 = vld [vmem:[#allocation2 + $0x68] ss:$16 sps:$4 sm:$0xff]   ;;  %v980_v16 = vld [vmem:[#allocation2 + $0x84] ss:$16 sps:$4 sm:$0xff]  }
  0x3d   : > { %606 = vmatpush1.bf16.msra.mxu0 %v966_v6  ;;  %647 = vmatpush1.bf16.msra.mxu1 %v967_v7  ;;  %v982_v17 = vld [vmem:[#allocation2 + $0x8c] ss:$16 sps:$4 sm:$0xff]   ;;  %v984_v18 = vld [vmem:[#allocation2 + $0x80] ss:$16 sps:$4 sm:$0xff]   ;;  %v985_v19 = vld [vmem:[#allocation2 + $0x88] ss:$16 sps:$4 sm:$0xff]  }
  0x3e   : > { %607 = vmatprep.subr.bf16.mxu0 %v968_v8  ;;  %648 = vmatprep.subr.bf16.mxu1 %v970_v9  ;;  %v986_v20 = vld [vmem:[#allocation2 + $0xa4] ss:$16 sps:$4 sm:$0xff]   ;;  %v988_v21 = vld [vmem:[#allocation2 + $0xac] ss:$16 sps:$4 sm:$0xff]   ;;  %v990_v22 = vld [vmem:[#allocation2 + $0xa0] ss:$16 sps:$4 sm:$0xff]  }
  0x3f   : > { %v991_v23 = vld [vmem:[#allocation2 + $0xa8] ss:$16 sps:$4 sm:$0xff]   ;;  %v992_v24 = vld [vmem:[#allocation2 + $0xc4] ss:$16 sps:$4 sm:$0xff]   ;;  %v994_v25 = vld [vmem:[#allocation2 + $0xcc] ss:$16 sps:$4 sm:$0xff]  }
  0x40   : > { %v996_v26 = vld [vmem:[#allocation2 + $0xc0] ss:$16 sps:$4 sm:$0xff]   ;;  %v997_v27 = vld [vmem:[#allocation2 + $0xc8] ss:$16 sps:$4 sm:$0xff]   ;;  %v998_v28 = vld [vmem:[#allocation2 + $0xe4] ss:$16 sps:$4 sm:$0xff]  }
  0x41   : > { %608 = vmatpush1.bf16.msra.mxu0 %v972_v10  ;;  %649 = vmatpush1.bf16.msra.mxu1 %v973_v11  ;;  %v1000_v29 = vld [vmem:[#allocation2 + $0xec] ss:$16 sps:$4 sm:$0xff]   ;;  %v1002_v30 = vld [vmem:[#allocation2 + $0xe0] ss:$16 sps:$4 sm:$0xff]   ;;  %v1003_v31 = vld [vmem:[#allocation2 + $0xe8] ss:$16 sps:$4 sm:$0xff]  }
  0x42   : > { %609 = vmatprep.subr.bf16.mxu0 %v974_v12  ;;  %650 = vmatprep.subr.bf16.mxu1 %v976_v13  ;;  %v1004_v32 = vld [vmem:[#allocation2 + $0x104] ss:$16 sps:$4 sm:$0xff]   ;;  %p194_p4 = scmp.lt.s32.totalorder %s1155_s12, 1  ;;  %v1006_v33 = vld [vmem:[#allocation2 + $0x10c] ss:$16 sps:$4 sm:$0xff]   ;;  %s190_s27 = sand.u32 1, %s1147_s10  }
  0x43   : > { %v1008_v34 = vld [vmem:[#allocation2 + $0x100] ss:$16 sps:$4 sm:$0xff]   ;;  %v1009_v35 = vld [vmem:[#allocation2 + $0x108] ss:$16 sps:$4 sm:$0xff]   ;;  %v1010_v36 = vld [vmem:[#allocation2 + $0x124] ss:$16 sps:$4 sm:$0xff]  }
  0x44   : > { %s195_s20 = scalar_select %p194_p4, %s1155_s12, 1  ;;  %v1012_v37 = vld [vmem:[#allocation2 + $0x12c] ss:$16 sps:$4 sm:$0xff]   ;;  %v1014_v38 = vld [vmem:[#allocation2 + $0x120] ss:$16 sps:$4 sm:$0xff]  }
  0x45   : > { %610 = vmatpush1.bf16.msra.mxu0 %v978_v14  ;;  %651 = vmatpush1.bf16.msra.mxu1 %v979_v15  ;;  %v1015_v39 = vld [vmem:[#allocation2 + $0x128] ss:$16 sps:$4 sm:$0xff]   ;;  %v1016_v40 = vld [vmem:[#allocation2 + $0x144] ss:$16 sps:$4 sm:$0xff]   ;;  %v1018_v41 = vld [vmem:[#allocation2 + $0x14c] ss:$16 sps:$4 sm:$0xff]  }
  0x46   : > { %611 = vmatprep.subr.bf16.mxu0 %v980_v16  ;;  %652 = vmatprep.subr.bf16.mxu1 %v982_v17  ;;  %s886_s23 = sshll.u32 %s195_s20, 3  ;;  %v1020_v42 = vld [vmem:[#allocation2 + $0x140] ss:$16 sps:$4 sm:$0xff]   ;;  %v1021_v43 = vld [vmem:[#allocation2 + $0x148] ss:$16 sps:$4 sm:$0xff]   ;;  %s813_s28 = sshll.u32 %s190_s27, 5 }
  0x47   : > { %s202_s26 = scalar_lea.vmem %s1335_s1, %s886_s23  ;;  %v1022_v44 = vld [vmem:[#allocation2 + $0x164] ss:$16 sps:$4 sm:$0xff]   ;;  %v1024_v45 = vld [vmem:[#allocation2 + $0x16c] ss:$16 sps:$4 sm:$0xff]   ;;  %v1026_v48 = vld [vmem:[#allocation2 + $0x160] ss:$16 sps:$4 sm:$0xff]  }
  0x48   : > { %v204_v46 = vld [vmem:[%s202_s26] sm:$0xf]  ;;  %v205_v47 = vld [vmem:[%s202_s26 + $0x4] sm:$0x1]  ;;  %v1027_v49 = vld [vmem:[#allocation2 + $0x168] ss:$16 sps:$4 sm:$0xff]  }
  0x49   : > { %612 = vmatpush1.bf16.msra.mxu0 %v984_v18  ;;  %653 = vmatpush1.bf16.msra.mxu1 %v985_v19  ;;  %v816_v50 = vcombine.low %v204_v46, %v205_v47  ;;  %v1028_v51 = vld [vmem:[#allocation2 + $0x184] ss:$16 sps:$4 sm:$0xff]   ;;  %v1030_v52 = vld [vmem:[#allocation2 + $0x18c] ss:$16 sps:$4 sm:$0xff]   ;;  %v1032_v55 = vld [vmem:[#allocation2 + $0x180] ss:$16 sps:$4 sm:$0xff]  }
  0x4a   : > { %613 = vmatprep.subr.bf16.mxu0 %v986_v20  ;;  %654 = vmatprep.subr.bf16.mxu1 %v988_v21  ;;  %v1033_v56 = vld [vmem:[#allocation2 + $0x188] ss:$16 sps:$4 sm:$0xff]   ;;  %v1034_v58 = vld [vmem:[#allocation2 + $0x1a4] ss:$16 sps:$4 sm:$0xff]   ;;  %v1036_v59 = vld [vmem:[#allocation2 + $0x1ac] ss:$16 sps:$4 sm:$0xff]  }
  0x4b   : > { %v212_v53 = vshrl.u32 %v816_v50, 16  ;;  %v214_v54 = vshll.u32 %v816_v50, 16  ;;  %v1038_v61 = vld [vmem:[#allocation2 + $0x1a0] ss:$16 sps:$4 sm:$0xff]   ;;  %v1039_v62 = vld [vmem:[#allocation2 + $0x1a8] ss:$16 sps:$4 sm:$0xff]  }
  0x4c   : > { %v1040_v63 = vld [vmem:[#allocation2 + $0x1c4] ss:$16 sps:$4 sm:$0xff]   ;;  %v1042_v0 = vld [vmem:[#allocation2 + $0x1cc] ss:$16 sps:$4 sm:$0xff]   ;;  %v1044_v1 = vld [vmem:[#allocation2 + $0x1c0] ss:$16 sps:$4 sm:$0xff]  }
  0x4d   : > { %614 = vmatpush1.bf16.msra.mxu0 %v990_v22  ;;  %655 = vmatpush1.bf16.msra.mxu1 %v991_v23  ;;  %v216_v57 = vrot.slane %v214_v54, 1  ;;  %v1045_v2 = vld [vmem:[#allocation2 + $0x1c8] ss:$16 sps:$4 sm:$0xff]   ;;  %v1046_v3 = vld [vmem:[#allocation2 + $0x1e4] ss:$16 sps:$4 sm:$0xff]   ;;  %s192_s29 = scalar_lea.vmem [#allocation5], %s813_s28 }
  0x4e   : > { %615 = vmatprep.subr.bf16.mxu0 %v992_v24  ;;  %656 = vmatprep.subr.bf16.mxu1 %v994_v25  ;;  %v1048_v4 = vld [vmem:[#allocation2 + $0x1ec] ss:$16 sps:$4 sm:$0xff]   ;;  %v1050_v5 = vld [vmem:[#allocation2 + $0x1e0] ss:$16 sps:$4 sm:$0xff]   ;;  %v1051_v6 = vld [vmem:[#allocation2 + $0x1e8] ss:$16 sps:$4 sm:$0xff]  }
  0x4f   : > { %v217_v60 = vor.u32 %v216_v57, %v212_v53  ;;  %s708_s30 = sshll.u32 %s192_s29, 4  ;;  %s887_s3 = sshll.u32 %s1155_s12, 9  ;;  %s1284_s30 = int_to_ptr.vmem [resolvable:$true] %s708_s30 }
  0x50   : > { %s1289_s6 = scalar_lea.hbm %s1336_s2, %s887_s3  ;;  %s690_s12 = scalar_lea.sflag [#allocation4], %s190_s27 }
  0x51   : > { %616 = vmatpush1.bf16.msra.mxu0 %v996_v26  ;;  %657 = vmatpush1.bf16.msra.mxu1 %v997_v27  ;;  %s1081_s7 = scalar_lea.vmem %s1284_s30, 512  ;;  %p1348_p10 = scmp.ne.s32.totalorder %s1341_s19, 0 }
  0x52   : > { %617 = vmatprep.subr.bf16.mxu0 %v998_v28  ;;  %658 = vmatprep.subr.bf16.mxu1 %v1000_v29  ;;  %p1082_p8 = scmp.ne.s32.totalorder %s1284_s30, %s1081_s7  ;;  %s1168_s8 = smov [#allocation5]  }
  0x53   : > { %635 = vmatprep.mubr.bf16.mxu0 %v217_v60  ;;  %676 = vmatprep.mubr.bf16.mxu1 %v217_v60  ;;  %s1085_s15 = sshll.u32 %s1168_s8, 4  ;;  %s1086_s15 = int_to_ptr.vmem [resolvable:$false] %s1085_s15 }
  0x54   : > { %p1083_p11 = pnand %p1082_p8, %p1348_p10  ;;  %s1087_s16 = scalar_lea.vmem %s1086_s15, 1024 }
  0x55   : > { %618 = vmatpush1.bf16.msra.mxu0 %v1002_v30  ;;  %659 = vmatpush1.bf16.msra.mxu1 %v1003_v31  ;;  %p1088_p1 = scmp.lt.s32.totalorder %s1284_s30, %s1086_s15  ;;  %p1089_p3 = scmp.lt.s32.totalorder %s1087_s16, %s1081_s7 }
  0x56   : > { %619 = vmatprep.subr.bf16.mxu0 %v1004_v32  ;;  %660 = vmatprep.subr.bf16.mxu1 %v1006_v33  ;;  %p1084_p13 = pneg %p1083_p11 }
  0x57   : > { %p1090_p5 = por %p1089_p3, %p1088_p1 }
  0x59   : > { %620 = vmatpush1.bf16.msra.mxu0 %v1008_v34  ;;  %661 = vmatpush1.bf16.msra.mxu1 %v1009_v35  ;;  %p1091_p6 = pnand %p1090_p5, %p1084_p13 }
  0x5a   : > { %621 = vmatprep.subr.bf16.mxu0 %v1010_v36  ;;  %662 = vmatprep.subr.bf16.mxu1 %v1012_v37 }
  0x5d   : > { %622 = vmatpush1.bf16.msra.mxu0 %v1014_v38  ;;  %663 = vmatpush1.bf16.msra.mxu1 %v1015_v39 }
  0x5e   : > { %623 = vmatprep.subr.bf16.mxu0 %v1016_v40  ;;  %664 = vmatprep.subr.bf16.mxu1 %v1018_v41 }
  0x61   : > { %624 = vmatpush1.bf16.msra.mxu0 %v1020_v42  ;;  %665 = vmatpush1.bf16.msra.mxu1 %v1021_v43 }
  0x62   : > { %625 = vmatprep.subr.bf16.mxu0 %v1022_v44  ;;  %666 = vmatprep.subr.bf16.mxu1 %v1024_v45 }
  0x65   : > { %626 = vmatpush1.bf16.msra.mxu0 %v1026_v48  ;;  %667 = vmatpush1.bf16.msra.mxu1 %v1027_v49 }
  0x66   : > { %627 = vmatprep.subr.bf16.mxu0 %v1028_v51  ;;  %668 = vmatprep.subr.bf16.mxu1 %v1030_v52 }
  0x69   : > { %628 = vmatpush1.bf16.msra.mxu0 %v1032_v55  ;;  %669 = vmatpush1.bf16.msra.mxu1 %v1033_v56 }
  0x6a   : > { %629 = vmatprep.subr.bf16.mxu0 %v1034_v58  ;;  %670 = vmatprep.subr.bf16.mxu1 %v1036_v59 }
  0x6d   : > { %630 = vmatpush1.bf16.msra.mxu0 %v1038_v61  ;;  %671 = vmatpush1.bf16.msra.mxu1 %v1039_v62 }
  0x6e   : > { %631 = vmatprep.subr.bf16.mxu0 %v1040_v63  ;;  %672 = vmatprep.subr.bf16.mxu1 %v1042_v0 }
  0x71   : > { %632 = vmatpush1.bf16.msra.mxu0 %v1044_v1  ;;  %673 = vmatpush1.bf16.msra.mxu1 %v1045_v2 }
  0x72   : > { %633 = vmatprep.subr.bf16.mxu0 %v1046_v3  ;;  %674 = vmatprep.subr.bf16.mxu1 %v1048_v4 }
  0x75   : > { %634 = vmatpush1.bf16.msra.mxu0 %v1050_v5  ;;  %675 = vmatpush1.bf16.msra.mxu1 %v1051_v6 }
  0x78   : > { %636 = vmatmul.mubr.bf16.vlgmr.msra.gmra.mrb[0].mxu0 %v204_v46  ;;  %677 = vmatmul.mubr.bf16.vlgmr.msra.gmra.mrb[0].mxu1 %v204_v46 }
 0x14b   : > { %v637_v7 = vpop.f32.mrb[0].mxu0  ;;  %v678_v8 = vpop.f32.mrb[0].mxu1 }
 0x14c   : > { %685 = vst [vmem:[%s192_s29] sm:$0xff] %v637_v7  ;;  %687 = vst [vmem:[%s192_s29 + $0x10] sm:$0xff] %v678_v8  ;;  %v639_v9 = vpop.f32.mrb[1].mxu0  ;;  %v680_v10 = vpop.f32.mrb[1].mxu1 }
 0x14d   : > { %686 = vst [vmem:[%s192_s29 + $0x8] sm:$0xff] %v639_v9  ;;  %688 = vst [vmem:[%s192_s29 + $0x18] sm:$0xff] %v680_v10  ;;  %v641_v11 = vpop.f32.mrb[2].mxu0  ;;  %v682_v12 = vpop.f32.mrb[2].mxu1 }
 0x14e   : > { %v642_v13 = vpop.f32.mrb[3].mxu0  ;;  %v683_v14 = vpop.f32.mrb[3].mxu1 }
 0x14f   : > { %1094 = shalt.err (!%p1091_p6)
}
 0x150   : > { %s1095_s18 = scalar_lea.hbm %s1289_s6, 512  ;;  %s1099_s24 = scalar_lea.hbm %s1336_s2, 1024 }
 0x151   : > { %p1096_p7 = scmp.ne.s32.totalorder %s1289_s6, %s1095_s18  ;;  %p1100_p0 = scmp.lt.u32.totalorder %s1289_s6, %s1336_s2 }
 0x152   : > { %p1101_p2 = scmp.lt.u32.totalorder %s1099_s24, %s1095_s18  ;;  %p1103_p8 = scmp.lt.u32.totalorder %s1095_s18, %s1289_s6 }
 0x153   : > { %p1097_p9 = pnand %p1096_p7, %p1348_p10 }
 0x154   : > { %p1102_p4 = por %p1101_p2, %p1100_p0 }
 0x155   : > { %p1098_p12 = pneg %p1097_p9 }
 0x156   : > { %p1104_p11 = por %p1103_p8, %p1102_p4 }
 0x158   : > { %p1105_p13 = pnand %p1104_p11, %p1098_p12 }
 0x15a   : > { %1108 = shalt.err (!%p1105_p13)
}
 0x15b   : > { %892 = dma.vmem_to_hbm [thread:$0]  (%p1348_p10), %s1284_s30, 512, %s1289_s6, %s690_s12  }
 0x15c PF: > { %p904_p1 = scmp.ge.s32.totalorder %s1163_s14, 2  ;;  %s720_s27 = sand.u32 1, %s1143_s9  }
 0x15d   : > { %p1349_p3 = scmp.ne.s32.totalorder %s1342_s21, 0  ;;  %s721_s28 = scalar_lea.sflag [#allocation4], %s720_s27 }
 0x15f   : > { %p899_p5 = pnand %p904_p1, %p1349_p3 }
 0x161   : > { %1138 = dma.done.wait (!%p899_p5), %s721_s28, 512  }
 0x162   : > { %1140 = vsyncadd (!%p899_p5), %s721_s28, 4294966784  ;;  %s16_s14 = sadd.s32 1, %s1163_s14   ;;  %s1350_s9 = smov %s1147_s10 }
 0x163   : > { %p13_p6 = scmp.ge.s32.totalorder %s16_s14, 4   ;;  %s1351_s10 = smov %s1151_s11 }
 0x164   : > { %s1352_s11 = smov %s1237_s22  ;;  %s1353_s12 = smov %s1159_s13 }
 0x165   : > { %s1354_s13 = smov %s1356_s17  ;;  %15 = sbr.rel (!%p13_p6) target bundleno = 5 (0x5), region = 69 }
 0x16c   :  { %726 = vsyncpa [#allocation3], 1 }
 0x16d   :  { %728 = vsyncpa [#allocation3 + $0x1], 1 }
 0x16e   :  { %729 = vsyncpa [#allocation4], 1 }
 0x16f   :  { %731 = vsyncpa [#allocation4 + $0x1], 1 }

</bundles_post_ra>
